<compile_context>
chip_gen: v7x
topology: tpu7x:2x2x1
jax: 0.10.0
libtpu: 0.0.40
codegen_flags: <defaults>
</compile_context>

<pallas_src>
import functools

import jax
import jax.numpy as jnp
from jax.experimental import pallas as pl
from jax.experimental.pallas import tpu as pltpu


# ----------------------------------------------------------------------------
# Kernel
# ----------------------------------------------------------------------------
def _make_mlp_kernel(num_layers: int, max_delta: float, matmul_dtype):
    """entry -> ReLU -> [hidden -> ReLU]*num_layers -> exit -> tanh * max_delta."""

    def kernel(*refs):
        # refs: x_ref, (w, b) * (num_layers + 2), o_ref
        x_ref = refs[0]
        o_ref = refs[-1]
        p = refs[1:-1]

        def linear(h, w_ref, b_ref):
            # Matmul inputs in matmul_dtype (f32 or bf16), accumulate in f32.
            acc = jnp.dot(
                h.astype(matmul_dtype),
                w_ref[...].astype(matmul_dtype),
                preferred_element_type=jnp.float32,
            )
            # Bias add / activations stay in f32 (portable to v5e VPU/EUP).
            return acc + b_ref[...].astype(jnp.float32)

        h = x_ref[...].astype(jnp.float32)

        # entry layer + ReLU
        h = jnp.maximum(linear(h, p[0], p[1]), 0.0)

        # hidden layers + ReLU
        for li in range(num_layers):
            h = jnp.maximum(linear(h, p[2 + 2 * li], p[3 + 2 * li]), 0.0)

        # exit layer
        h = linear(h, p[2 + 2 * num_layers], p[3 + 2 * num_layers])

        # tanh * max_delta (EUP tanh in f32), cast to output dtype.
        o_ref[...] = (jnp.tanh(h) * max_delta).astype(o_ref.dtype)

    return kernel


# ----------------------------------------------------------------------------
# Parameter init (mimics torch.nn.Linear: uniform +-1/sqrt(fan_in))
# ----------------------------------------------------------------------------
def init_params(key, input_size: int, num_layers: int, hidden_size: int):
    """Weights stored as (in_features, out_features); biases as (1, out_features)."""
    params = []
    dims = [(input_size, hidden_size)]
    dims += [(hidden_size, hidden_size)] * num_layers
    dims += [(hidden_size, input_size)]
    for (fan_in, fan_out) in dims:
        key, kw, kb = jax.random.split(key, 3)
        bound = 1.0 / (fan_in ** 0.5)
        w = jax.random.uniform(kw, (fan_in, fan_out), jnp.float32, -bound, bound)
        b = jax.random.uniform(kb, (1, fan_out), jnp.float32, -bound, bound)
        params.append((w, b))
    return params


# ----------------------------------------------------------------------------
# Forward wrapper
# ----------------------------------------------------------------------------
def _round_up(x: int, m: int) -> int:
    return (x + m - 1) // m * m


@functools.partial(
    jax.jit,
    static_argnames=("num_layers", "max_delta", "row_tile", "matmul_dtype"),
)
def perturbation_mlp_forward(
    x,
    params_flat,
    *,
    num_layers: int,
    max_delta: float,
    row_tile: int = 512,
    matmul_dtype=jnp.float32,
):
    """x: (B, 1, T) or (B, T) waveform. Returns residual of same shape."""
    orig_ndim = x.ndim
    if orig_ndim == 2:
        x = x[:, None, :]
    B, C, T = x.shape  # C == 1
    rows = B * C
    x2d = x.reshape(rows, T)

    hidden = params_flat[0].shape[1]
    L = num_layers

    LANE, SUBLANE = 128, 8
    T_pad = _round_up(max(T, 1), LANE)
    H_pad = _round_up(max(hidden, 1), LANE)

    # Row tile: multiple of 8 (f32 sublane), no larger than padded row count.
    TB = min(_round_up(row_tile, SUBLANE), _round_up(rows, SUBLANE))
    rows_pad = _round_up(rows, TB)

    # ---- pad activations to lane-dense / tile-aligned shapes ---------------
    x_p = jnp.pad(x2d, ((0, rows_pad - rows), (0, T_pad - T)))

    # ---- pad parameters (zero padding is exact, see header comment) --------
    dims_in = [T] + [hidden] * (L + 1)
    dims_out = [hidden] * (L + 1) + [T]
    pads_in = [T_pad] + [H_pad] * (L + 1)
    pads_out = [H_pad] * (L + 1) + [T_pad]

    padded_params = []
    for i in range(L + 2):
        w = params_flat[2 * i]
        b = params_flat[2 * i + 1]
        w_p = jnp.pad(
            w, ((0, pads_in[i] - dims_in[i]), (0, pads_out[i] - dims_out[i]))
        ).astype(matmul_dtype)  # bf16 storage halves resident VMEM when used
        b_p = jnp.pad(b, ((0, 0), (0, pads_out[i] - dims_out[i]))).astype(jnp.float32)
        padded_params.extend([w_p, b_p])

    # ---- grid / specs -------------------------------------------------------
    grid = (rows_pad // TB,)

    x_spec = pl.BlockSpec((TB, T_pad), lambda i: (i, 0))
    out_spec = pl.BlockSpec((TB, T_pad), lambda i: (i, 0))
    # Weights/biases: full-array blocks, constant block index -> fetched once,
    # resident in VMEM for every grid step.
    param_specs = [
        pl.BlockSpec(tuple(p.shape), lambda i: (0, 0)) for p in padded_params
    ]

    # ---- VMEM budget (32 MiB floor, 64 MiB v7x physical ceiling) ------------
    weight_bytes = sum(int(p.size) * p.dtype.itemsize for p in padded_params)
    io_bytes = 2 * 2 * TB * T_pad * 4           # double-buffered x + out (f32)
    act_bytes = 4 * TB * max(T_pad, H_pad) * 4  # live f32 intermediates headroom
    vmem_limit = int(
        min(max(weight_bytes + io_bytes + act_bytes + (8 << 20), 32 << 20), 64 << 20)
    )
    # TODO(synk): if T or hidden grow so entry/exit weights alone approach the
    # v7x 64 MiB VMEM, add K/N-tiling grid axes for those two matmuls instead
    # of keeping them fully resident.

    # ---- cost estimate -------------------------------------------------------
    flops = 2 * rows_pad * (T_pad * H_pad + L * H_pad * H_pad + H_pad * T_pad)
    transcendentals = rows_pad * T_pad  # tanh
    bytes_accessed = (
        int(x_p.size) * 4 + rows_pad * T_pad * x.dtype.itemsize + weight_bytes
    )
    cost = pl.CostEstimate(
        flops=flops, transcendentals=transcendentals, bytes_accessed=bytes_accessed
    )

    kernel = _make_mlp_kernel(num_layers, max_delta, matmul_dtype)

    out_p = pl.pallas_call(
        kernel,
        out_shape=jax.ShapeDtypeStruct((rows_pad, T_pad), x.dtype),
        grid=grid,
        in_specs=[x_spec] + param_specs,
        out_specs=out_spec,
        compiler_params=pltpu.CompilerParams(
            dimension_semantics=("parallel",),
            vmem_limit_bytes=vmem_limit,
        ),
        cost_estimate=cost,
    )(x_p, *padded_params)

    out = out_p[:rows, :T].reshape(B, C, T)
    if orig_ndim == 2:
        out = out[:, 0, :]
    return out


# ----------------------------------------------------------------------------
# Pure-JAX reference
# ----------------------------------------------------------------------------
def _reference_forward(x, params, max_delta):
    orig_ndim = x.ndim
    if orig_ndim == 2:
        x = x[:, None, :]
    h = x.astype(jnp.float32)
    n = len(params)
    for i, (w, b) in enumerate(params):
        h = h @ w + b[0]
        if i < n - 1:
            h = jnp.maximum(h, 0.0)
    out = jnp.tanh(h) * max_delta
    if orig_ndim == 2:
        out = out[:, 0, :]
    return out


if __name__ == "__main__":
    # Small, module-consistent shapes: waveform (B, 1, T) with input_size = T.
    B = 2
    T = 16          # input_size
    HIDDEN = 32     # hidden_size
    NUM_LAYERS = 2  # number of hidden layers
    MAX_DELTA = 0.05

    key = jax.random.PRNGKey(0)
    k_x, k_p = jax.random.split(key)

    x = jax.random.normal(k_x, (B, 1, T), jnp.float32)
    params = init_params(k_p, T, NUM_LAYERS, HIDDEN)
    params_flat = tuple(p for wb in params for p in wb)

    ref = _reference_forward(x, params, MAX_DELTA)

    # f32 matmul path (default; bit-accurate vs reference)
    out = perturbation_mlp_forward(
        x, params_flat, num_layers=NUM_LAYERS, max_delta=MAX_DELTA,
        matmul_dtype=jnp.float32,
    )
    out = jax.block_until_ready(out)
    assert out.shape == x.shape, (out.shape, x.shape)
    assert jnp.allclose(out, ref, atol=1e-5, rtol=1e-5), "f32 mismatch vs reference"

    # bf16 matmul path (v6e/v7x MXU fast path; tanh*max_delta compresses error)
    out_bf16 = perturbation_mlp_forward(
        x, params_flat, num_layers=NUM_LAYERS, max_delta=MAX_DELTA,
        matmul_dtype=jnp.bfloat16,
    )
    out_bf16 = jax.block_until_ready(out_bf16)
    assert out_bf16.shape == x.shape
    assert jnp.allclose(out_bf16, ref, atol=1e-2, rtol=5e-2), "bf16 mismatch vs reference"

    print("KERNEL_OK")
</pallas_src>

<mosaic_0001>
module attributes {stable_mosaic.version = 11 : i64} {
  func.func @kernel(%arg0: i32, %arg1: memref<8x128xf32, #tpu.memory_space<vmem>>, %arg2: memref<128x128xf32, #tpu.memory_space<vmem>>, %arg3: memref<1x128xf32, #tpu.memory_space<vmem>>, %arg4: memref<128x128xf32, #tpu.memory_space<vmem>>, %arg5: memref<1x128xf32, #tpu.memory_space<vmem>>, %arg6: memref<128x128xf32, #tpu.memory_space<vmem>>, %arg7: memref<1x128xf32, #tpu.memory_space<vmem>>, %arg8: memref<128x128xf32, #tpu.memory_space<vmem>>, %arg9: memref<1x128xf32, #tpu.memory_space<vmem>>, %arg10: memref<8x128xf32, #tpu.memory_space<vmem>>) attributes {dimension_semantics = [#tpu.dimension_semantics<parallel>], iteration_bounds = array<i64: 1>, scalar_prefetch = 0 : i64, scratch_operands = 0 : i64, tpu.core_type = #tpu.core_type<tc>, window_params = [{transform_indices = @transform_0, window_bounds = array<i64: 8, 128>}, {pipeline_mode = #tpu.pipeline_mode<synchronous>, transform_indices = @transform_1, window_bounds = array<i64: 128, 128>}, {pipeline_mode = #tpu.pipeline_mode<synchronous>, transform_indices = @transform_2, window_bounds = array<i64: 1, 128>}, {pipeline_mode = #tpu.pipeline_mode<synchronous>, transform_indices = @transform_3, window_bounds = array<i64: 128, 128>}, {pipeline_mode = #tpu.pipeline_mode<synchronous>, transform_indices = @transform_4, window_bounds = array<i64: 1, 128>}, {pipeline_mode = #tpu.pipeline_mode<synchronous>, transform_indices = @transform_5, window_bounds = array<i64: 128, 128>}, {pipeline_mode = #tpu.pipeline_mode<synchronous>, transform_indices = @transform_6, window_bounds = array<i64: 1, 128>}, {pipeline_mode = #tpu.pipeline_mode<synchronous>, transform_indices = @transform_7, window_bounds = array<i64: 128, 128>}, {pipeline_mode = #tpu.pipeline_mode<synchronous>, transform_indices = @transform_8, window_bounds = array<i64: 1, 128>}, {transform_indices = @transform_9, window_bounds = array<i64: 8, 128>}]} {
    %c0 = arith.constant 0 : index
    %c0_0 = arith.constant 0 : index
    %0 = vector.load %arg1[%c0, %c0_0] : memref<8x128xf32, #tpu.memory_space<vmem>>, vector<8x128xf32>
    %c0_1 = arith.constant 0 : index
    %c0_2 = arith.constant 0 : index
    %1 = vector.load %arg2[%c0_1, %c0_2] : memref<128x128xf32, #tpu.memory_space<vmem>>, vector<128x128xf32>
    %cst = arith.constant dense<0.000000e+00> : vector<8x128xf32>
    %2 = tpu.matmul %0, %1, %cst {dimension_numbers = #tpu.dot_dimension_numbers<[1], [0], [0], [1], [0, 0, 1, 1], [], []>} : vector<8x128xf32>, vector<128x128xf32>, vector<8x128xf32> -> vector<8x128xf32>
    %c0_3 = arith.constant 0 : index
    %c0_4 = arith.constant 0 : index
    %3 = vector.load %arg3[%c0_3, %c0_4] : memref<1x128xf32, #tpu.memory_space<vmem>>, vector<1x128xf32>
    %4 = vector.broadcast %3 : vector<1x128xf32> to vector<8x128xf32>
    %5 = arith.addf %2, %4 : vector<8x128xf32>
    %cst_5 = arith.constant 0.000000e+00 : f32
    %6 = vector.broadcast %cst_5 : f32 to vector<8x128xf32>
    %7 = arith.maximumf %5, %6 : vector<8x128xf32>
    %c0_6 = arith.constant 0 : index
    %c0_7 = arith.constant 0 : index
    %8 = vector.load %arg4[%c0_6, %c0_7] : memref<128x128xf32, #tpu.memory_space<vmem>>, vector<128x128xf32>
    %cst_8 = arith.constant dense<0.000000e+00> : vector<8x128xf32>
    %9 = tpu.matmul %7, %8, %cst_8 {dimension_numbers = #tpu.dot_dimension_numbers<[1], [0], [0], [1], [0, 0, 1, 1], [], []>} : vector<8x128xf32>, vector<128x128xf32>, vector<8x128xf32> -> vector<8x128xf32>
    %c0_9 = arith.constant 0 : index
    %c0_10 = arith.constant 0 : index
    %10 = vector.load %arg5[%c0_9, %c0_10] : memref<1x128xf32, #tpu.memory_space<vmem>>, vector<1x128xf32>
    %11 = vector.broadcast %10 : vector<1x128xf32> to vector<8x128xf32>
    %12 = arith.addf %9, %11 : vector<8x128xf32>
    %cst_11 = arith.constant 0.000000e+00 : f32
    %13 = vector.broadcast %cst_11 : f32 to vector<8x128xf32>
    %14 = arith.maximumf %12, %13 : vector<8x128xf32>
    %c0_12 = arith.constant 0 : index
    %c0_13 = arith.constant 0 : index
    %15 = vector.load %arg6[%c0_12, %c0_13] : memref<128x128xf32, #tpu.memory_space<vmem>>, vector<128x128xf32>
    %cst_14 = arith.constant dense<0.000000e+00> : vector<8x128xf32>
    %16 = tpu.matmul %14, %15, %cst_14 {dimension_numbers = #tpu.dot_dimension_numbers<[1], [0], [0], [1], [0, 0, 1, 1], [], []>} : vector<8x128xf32>, vector<128x128xf32>, vector<8x128xf32> -> vector<8x128xf32>
    %c0_15 = arith.constant 0 : index
    %c0_16 = arith.constant 0 : index
    %17 = vector.load %arg7[%c0_15, %c0_16] : memref<1x128xf32, #tpu.memory_space<vmem>>, vector<1x128xf32>
    %18 = vector.broadcast %17 : vector<1x128xf32> to vector<8x128xf32>
    %19 = arith.addf %16, %18 : vector<8x128xf32>
    %cst_17 = arith.constant 0.000000e+00 : f32
    %20 = vector.broadcast %cst_17 : f32 to vector<8x128xf32>
    %21 = arith.maximumf %19, %20 : vector<8x128xf32>
    %c0_18 = arith.constant 0 : index
    %c0_19 = arith.constant 0 : index
    %22 = vector.load %arg8[%c0_18, %c0_19] : memref<128x128xf32, #tpu.memory_space<vmem>>, vector<128x128xf32>
    %cst_20 = arith.constant dense<0.000000e+00> : vector<8x128xf32>
    %23 = tpu.matmul %21, %22, %cst_20 {dimension_numbers = #tpu.dot_dimension_numbers<[1], [0], [0], [1], [0, 0, 1, 1], [], []>} : vector<8x128xf32>, vector<128x128xf32>, vector<8x128xf32> -> vector<8x128xf32>
    %c0_21 = arith.constant 0 : index
    %c0_22 = arith.constant 0 : index
    %24 = vector.load %arg9[%c0_21, %c0_22] : memref<1x128xf32, #tpu.memory_space<vmem>>, vector<1x128xf32>
    %25 = vector.broadcast %24 : vector<1x128xf32> to vector<8x128xf32>
    %26 = arith.addf %23, %25 : vector<8x128xf32>
    %27 = math.tanh %26 : vector<8x128xf32>
    %cst_23 = arith.constant 5.000000e-02 : f32
    %28 = vector.broadcast %cst_23 : f32 to vector<8x128xf32>
    %29 = arith.mulf %27, %28 : vector<8x128xf32>
    %c0_24 = arith.constant 0 : index
    %c0_25 = arith.constant 0 : index
    %30 = vector.load %arg10[%c0_24, %c0_25] : memref<8x128xf32, #tpu.memory_space<vmem>>, vector<8x128xf32>
    tpu.vector_store %arg10[%c0_24, %c0_25], %29 {strides = array<i32>} : memref<8x128xf32, #tpu.memory_space<vmem>>, vector<8x128xf32>,
    return
  }
  func.func @transform_0(%arg0: i32) -> (i32, i32) {
    %c0_i32 = arith.constant 0 : i32
    %c0_i32_0 = arith.constant 0 : i32
    return %arg0, %c0_i32 : i32, i32
  }
  func.func @transform_1(%arg0: i32) -> (i32, i32) {
    %c0_i32 = arith.constant 0 : i32
    %c0_i32_0 = arith.constant 0 : i32
    %c0_i32_1 = arith.constant 0 : i32
    return %c0_i32, %c0_i32_0 : i32, i32
  }
  func.func @transform_2(%arg0: i32) -> (i32, i32) {
    %c0_i32 = arith.constant 0 : i32
    %c0_i32_0 = arith.constant 0 : i32
    %c0_i32_1 = arith.constant 0 : i32
    return %c0_i32, %c0_i32_0 : i32, i32
  }
  func.func @transform_3(%arg0: i32) -> (i32, i32) {
    %c0_i32 = arith.constant 0 : i32
    %c0_i32_0 = arith.constant 0 : i32
    %c0_i32_1 = arith.constant 0 : i32
    return %c0_i32, %c0_i32_0 : i32, i32
  }
  func.func @transform_4(%arg0: i32) -> (i32, i32) {
    %c0_i32 = arith.constant 0 : i32
    %c0_i32_0 = arith.constant 0 : i32
    %c0_i32_1 = arith.constant 0 : i32
    return %c0_i32, %c0_i32_0 : i32, i32
  }
  func.func @transform_5(%arg0: i32) -> (i32, i32) {
    %c0_i32 = arith.constant 0 : i32
    %c0_i32_0 = arith.constant 0 : i32
    %c0_i32_1 = arith.constant 0 : i32
    return %c0_i32, %c0_i32_0 : i32, i32
  }
  func.func @transform_6(%arg0: i32) -> (i32, i32) {
    %c0_i32 = arith.constant 0 : i32
    %c0_i32_0 = arith.constant 0 : i32
    %c0_i32_1 = arith.constant 0 : i32
    return %c0_i32, %c0_i32_0 : i32, i32
  }
  func.func @transform_7(%arg0: i32) -> (i32, i32) {
    %c0_i32 = arith.constant 0 : i32
    %c0_i32_0 = arith.constant 0 : i32
    %c0_i32_1 = arith.constant 0 : i32
    return %c0_i32, %c0_i32_0 : i32, i32
  }
  func.func @transform_8(%arg0: i32) -> (i32, i32) {
    %c0_i32 = arith.constant 0 : i32
    %c0_i32_0 = arith.constant 0 : i32
    %c0_i32_1 = arith.constant 0 : i32
    return %c0_i32, %c0_i32_0 : i32, i32
  }
  func.func @transform_9(%arg0: i32) -> (i32, i32) {
    %c0_i32 = arith.constant 0 : i32
    %c0_i32_0 = arith.constant 0 : i32
    return %arg0, %c0_i32 : i32, i32
  }
}

</mosaic_0001>

<bundles_post_ra>
// kernel: perturbation_mlp_forward.1
= control target key start
LH: loop header
LB: loop body
LE: loop exit
PB: predicated region body
PF: predicated region fallthrough
CT: control target
= control target key end

     0   :  { %v728_v0 = vmov 0.0|0.0   ;;  %vm729_vm0 = vmmov 0   ;;  %v730_v4 = vmov 0.0   ;;  %s1031_s1 = inlined_call_operand.vmem [shape: f32[128,128], index: 1, kind: input, shape index: {}]   ;;  %s1032_s3 = inlined_call_operand.vmem [shape: f32[128,128], index: 3, kind: input, shape index: {}]   ;;  %s1033_s0 = inlined_call_operand.vmem [shape: f32[8,128], index: 0, kind: input, shape index: {}]   ;;  %s1034_s5 = inlined_call_operand.vmem [shape: f32[128,128], index: 5, kind: input, shape index: {}]   ;;  %s1035_s2 = inlined_call_operand.vmem [shape: f32[1,128], index: 2, kind: input, shape index: {}]   ;;  %s1036_s7 = inlined_call_operand.vmem [shape: f32[128,128], index: 7, kind: input, shape index: {}]   ;;  %s1037_s4 = inlined_call_operand.vmem [shape: f32[1,128], index: 4, kind: input, shape index: {}]   ;;  %s1038_s6 = inlined_call_operand.vmem [shape: f32[1,128], index: 6, kind: input, shape index: {}]   ;;  %s1039_s8 = inlined_call_operand.vmem [shape: f32[1,128], index: 8, kind: input, shape index: {}]   ;;  %s1040_s9 = inlined_call_operand.vmem [shape: f32[8,128], index: 9, kind: output, shape index: {}]  }
   0x1   :  { %627 = vmatprep.subr.bf16.mxu0 %v728_v0  ;;  %v33_v1 = vld [vmem:[%s1031_s1] sm:$0xff]  ;;  %v34_v2 = vld [vmem:[%s1031_s1 + $0x8] sm:$0xff]  ;;  %v35_v3 = vld [vmem:[%s1031_s1 + $0x10] sm:$0xff]  ;;  %519 = vmatprep.mubr.msk.f32.mxu0 %vm729_vm0, %v730_v4 }
   0x2   :  { %v628_v5 = vpack.c.bf16 %v34_v2, %v33_v1  ;;  %v36_v6 = vld [vmem:[%s1031_s1 + $0x18] sm:$0xff]  ;;  %651 = vmatprep.subr.bf16.mxu1 %v728_v0  ;;  %554 = vmatprep.mubr.msk.f32.mxu1 %vm729_vm0, %v730_v4  ;;  %v37_v8 = vld [vmem:[%s1031_s1 + $0x20] sm:$0xff]  ;;  %v38_v9 = vld [vmem:[%s1031_s1 + $0x28] sm:$0xff] }
   0x3   :  { %v631_v7 = vpack.c.bf16 %v36_v6, %v35_v3  ;;  %v127_v10 = vld [vmem:[%s1032_s3] sm:$0xff]  ;;  %v128_v11 = vld [vmem:[%s1032_s3 + $0x8] sm:$0xff]  ;;  %v129_v12 = vld [vmem:[%s1032_s3 + $0x10] sm:$0xff]  ;;  %v634_v14 = vpack.c.bf16 %v38_v9, %v37_v8 }
   0x4   :  { %629 = vmatpush3.bf16.msra.mxu0 %v628_v5  ;;  %v130_v13 = vld [vmem:[%s1032_s3 + $0x18] sm:$0xff]  ;;  %v652_v15 = vpack.c.bf16 %v128_v11, %v127_v10  ;;  %v39_v16 = vld [vmem:[%s1031_s1 + $0x30] sm:$0xff]  ;;  %v131_v19 = vld [vmem:[%s1032_s3 + $0x20] sm:$0xff] }
   0x5   :  { %630 = vmatprep.subr.bf16.mxu0 %v728_v0  ;;  %v40_v17 = vld [vmem:[%s1031_s1 + $0x38] sm:$0xff]  ;;  %v655_v18 = vpack.c.bf16 %v130_v13, %v129_v12  ;;  %v132_v20 = vld [vmem:[%s1032_s3 + $0x28] sm:$0xff]  ;;  %v41_v22 = vld [vmem:[%s1031_s1 + $0x40] sm:$0xff] }
   0x6   :  { %653 = vmatpush3.bf16.msra.mxu1 %v652_v15  ;;  %v637_v21 = vpack.c.bf16 %v40_v17, %v39_v16  ;;  %v42_v23 = vld [vmem:[%s1031_s1 + $0x48] sm:$0xff]  ;;  %v658_v24 = vpack.c.bf16 %v132_v20, %v131_v19  ;;  %v133_v25 = vld [vmem:[%s1032_s3 + $0x30] sm:$0xff]  ;;  %v134_v26 = vld [vmem:[%s1032_s3 + $0x38] sm:$0xff] }
   0x7   :  { %654 = vmatprep.subr.bf16.mxu1 %v728_v0  ;;  %v640_v27 = vpack.c.bf16 %v42_v23, %v41_v22  ;;  %v43_v28 = vld [vmem:[%s1031_s1 + $0x50] sm:$0xff]  ;;  %v44_v29 = vld [vmem:[%s1031_s1 + $0x58] sm:$0xff]  ;;  %v661_v30 = vpack.c.bf16 %v134_v26, %v133_v25  ;;  %v135_v31 = vld [vmem:[%s1032_s3 + $0x40] sm:$0xff] }
   0x8   :  { %632 = vmatpush3.bf16.msra.mxu0 %v631_v7  ;;  %v136_v32 = vld [vmem:[%s1032_s3 + $0x48] sm:$0xff]  ;;  %v643_v33 = vpack.c.bf16 %v44_v29, %v43_v28  ;;  %v45_v34 = vld [vmem:[%s1031_s1 + $0x60] sm:$0xff]  ;;  %v137_v37 = vld [vmem:[%s1032_s3 + $0x50] sm:$0xff] }
   0x9   :  { %633 = vmatprep.subr.bf16.mxu0 %v728_v0  ;;  %v46_v35 = vld [vmem:[%s1031_s1 + $0x68] sm:$0xff]  ;;  %v664_v36 = vpack.c.bf16 %v136_v32, %v135_v31  ;;  %v138_v38 = vld [vmem:[%s1032_s3 + $0x58] sm:$0xff]  ;;  %v47_v40 = vld [vmem:[%s1031_s1 + $0x70] sm:$0xff] }
   0xa   :  { %656 = vmatpush3.bf16.msra.mxu1 %v655_v18  ;;  %v646_v39 = vpack.c.bf16 %v46_v35, %v45_v34  ;;  %v48_v41 = vld [vmem:[%s1031_s1 + $0x78] sm:$0xff]  ;;  %v667_v42 = vpack.c.bf16 %v138_v38, %v137_v37  ;;  %v139_v43 = vld [vmem:[%s1032_s3 + $0x60] sm:$0xff]  ;;  %v140_v44 = vld [vmem:[%s1032_s3 + $0x68] sm:$0xff] }
   0xb   :  { %657 = vmatprep.subr.bf16.mxu1 %v728_v0  ;;  %v649_v45 = vpack.c.bf16 %v48_v41, %v47_v40  ;;  %v670_v46 = vpack.c.bf16 %v140_v44, %v139_v43  ;;  %v32_v47 = vld [vmem:[%s1033_s0] sm:$0xff]  ;;  %v141_v48 = vld [vmem:[%s1032_s3 + $0x70] sm:$0xff]  ;;  %v142_v49 = vld [vmem:[%s1032_s3 + $0x78] sm:$0xff] }
   0xc   :  { %635 = vmatpush3.bf16.msra.mxu0 %v634_v14  ;;  %v673_v50 = vpack.c.bf16 %v142_v49, %v141_v48  ;;  %v221_v51 = vld [vmem:[%s1034_s5] sm:$0xff]  ;;  %v222_v52 = vld [vmem:[%s1034_s5 + $0x8] sm:$0xff]  ;;  %v223_v53 = vld [vmem:[%s1034_s5 + $0x10] sm:$0xff] }
   0xd   :  { %636 = vmatprep.subr.bf16.mxu0 %v728_v0  ;;  %v676_v54 = vpack.c.bf16 %v222_v52, %v221_v51  ;;  %v224_v55 = vld [vmem:[%s1034_s5 + $0x18] sm:$0xff]  ;;  %v225_v57 = vld [vmem:[%s1034_s5 + $0x20] sm:$0xff]  ;;  %v226_v58 = vld [vmem:[%s1034_s5 + $0x28] sm:$0xff] }
   0xe   :  { %659 = vmatpush3.bf16.msra.mxu1 %v658_v24  ;;  %v679_v56 = vpack.c.bf16 %v224_v55, %v223_v53  ;;  %v682_v59 = vpack.c.bf16 %v226_v58, %v225_v57  ;;  %v227_v60 = vld [vmem:[%s1034_s5 + $0x30] sm:$0xff]  ;;  %v228_v61 = vld [vmem:[%s1034_s5 + $0x38] sm:$0xff]  ;;  %v229_v63 = vld [vmem:[%s1034_s5 + $0x40] sm:$0xff] }
   0xf   :  { %660 = vmatprep.subr.bf16.mxu1 %v728_v0  ;;  %v685_v62 = vpack.c.bf16 %v228_v61, %v227_v60  ;;  %v230_v1 = vld [vmem:[%s1034_s5 + $0x48] sm:$0xff]  ;;  %v231_v3 = vld [vmem:[%s1034_s5 + $0x50] sm:$0xff]  ;;  %v232_v5 = vld [vmem:[%s1034_s5 + $0x58] sm:$0xff] }
  0x10   :  { %638 = vmatpush3.bf16.msra.mxu0 %v637_v21  ;;  %v688_v2 = vpack.c.bf16 %v230_v1, %v229_v63  ;;  %v691_v6 = vpack.c.bf16 %v232_v5, %v231_v3  ;;  %v233_v7 = vld [vmem:[%s1034_s5 + $0x60] sm:$0xff]  ;;  %v234_v8 = vld [vmem:[%s1034_s5 + $0x68] sm:$0xff]  ;;  %v235_v15 = vld [vmem:[%s1034_s5 + $0x70] sm:$0xff] }
  0x11   :  { %639 = vmatprep.subr.bf16.mxu0 %v728_v0  ;;  %v694_v9 = vpack.c.bf16 %v234_v8, %v233_v7  ;;  %v415_v10 = vld [vmem:[%s1035_s2] ss:$0 sm:$0xff]  ;;  %v236_v16 = vld [vmem:[%s1034_s5 + $0x78] sm:$0xff]  ;;  %v316_v19 = vld [vmem:[%s1036_s7 + $0x8] sm:$0xff] }
  0x12   :  { %662 = vmatpush3.bf16.msra.mxu1 %v661_v30  ;;  %v697_v17 = vpack.c.bf16 %v236_v16, %v235_v15  ;;  %v315_v18 = vld [vmem:[%s1036_s7] sm:$0xff]  ;;  %v318_v21 = vld [vmem:[%s1036_s7 + $0x18] sm:$0xff]  ;;  %v320_v24 = vld [vmem:[%s1036_s7 + $0x28] sm:$0xff] }
  0x13   :  { %663 = vmatprep.subr.bf16.mxu1 %v728_v0  ;;  %v700_v20 = vpack.c.bf16 %v316_v19, %v315_v18  ;;  %v319_v23 = vld [vmem:[%s1036_s7 + $0x20] sm:$0xff]  ;;  %v321_v26 = vld [vmem:[%s1036_s7 + $0x30] sm:$0xff]  ;;  %v324_v30 = vld [vmem:[%s1036_s7 + $0x48] sm:$0xff] }
  0x14   :  { %641 = vmatpush3.bf16.msra.mxu0 %v640_v27  ;;  %v706_v25 = vpack.c.bf16 %v320_v24, %v319_v23  ;;  %v322_v27 = vld [vmem:[%s1036_s7 + $0x38] sm:$0xff]  ;;  %v323_v29 = vld [vmem:[%s1036_s7 + $0x40] sm:$0xff]  ;;  %v325_v32 = vld [vmem:[%s1036_s7 + $0x50] sm:$0xff] }
  0x15   :  { %642 = vmatprep.subr.bf16.mxu0 %v728_v0  ;;  %v709_v28 = vpack.c.bf16 %v322_v27, %v321_v26  ;;  %v712_v31 = vpack.c.bf16 %v324_v30, %v323_v29  ;;  %v327_v35 = vld [vmem:[%s1036_s7 + $0x60] sm:$0xff]  ;;  %v329_v43 = vld [vmem:[%s1036_s7 + $0x70] sm:$0xff]  ;;  %v330_v44 = vld [vmem:[%s1036_s7 + $0x78] sm:$0xff] }
  0x16   :  { %665 = vmatpush3.bf16.msra.mxu1 %v664_v36  ;;  %v328_v36 = vld [vmem:[%s1036_s7 + $0x68] sm:$0xff]  ;;  %v416_v38 = vld [vmem:[%s1037_s4] ss:$0 sm:$0xff] }
  0x17   :  { %666 = vmatprep.subr.bf16.mxu1 %v728_v0  ;;  %v718_v37 = vpack.c.bf16 %v328_v36, %v327_v35 }
  0x18   :  { %644 = vmatpush3.bf16.msra.mxu0 %v643_v33  ;;  %v326_v33 = vld [vmem:[%s1036_s7 + $0x58] sm:$0xff] }
  0x19   :  { %645 = vmatprep.subr.bf16.mxu0 %v728_v0  ;;  %v715_v34 = vpack.c.bf16 %v326_v33, %v325_v32 }
  0x1a   :  { %668 = vmatpush3.bf16.msra.mxu1 %v667_v42 }
  0x1b   :  { %669 = vmatprep.subr.bf16.mxu1 %v728_v0 }
  0x1c   :  { %647 = vmatpush3.bf16.msra.mxu0 %v646_v39 }
  0x1d   :  { %648 = vmatprep.subr.bf16.mxu0 %v728_v0 }
  0x1e   :  { %671 = vmatpush3.bf16.msra.mxu1 %v670_v46 }
  0x1f   :  { %672 = vmatprep.subr.bf16.mxu1 %v728_v0 }
  0x20   :  { %650 = vmatpush3.bf16.msra.mxu0 %v649_v45  ;;  %v721_v45 = vpack.c.bf16 %v330_v44, %v329_v43 }
  0x21   :  { %675 = vmatprep.subr.bf16.mxu0 %v728_v0 }
  0x22   :  { %674 = vmatpush3.bf16.msra.mxu1 %v673_v50  ;;  %v418_v50 = vld [vmem:[%s1039_s8] ss:$0 sm:$0xff] }
  0x23   :  { %520 = vmatmul.mubr.f32.vlgmr.msra.gmra.mrb[0].mxu0 %v32_v47  ;;  %699 = vmatprep.subr.bf16.mxu1 %v728_v0 }
  0x24   :  { %589 = vmatprep.mubr.msk.f32.mxu0 %vm729_vm0, %v730_v4  ;;  %677 = vmatpush3.bf16.msra.mxu0 %v676_v54 }
  0x25   :  { %678 = vmatprep.subr.bf16.mxu0 %v728_v0 }
  0x28   :  { %680 = vmatpush3.bf16.msra.mxu0 %v679_v56 }
  0x29   :  { %681 = vmatprep.subr.bf16.mxu0 %v728_v0 }
  0x2c   :  { %683 = vmatpush3.bf16.msra.mxu0 %v682_v59 }
  0x2d   :  { %684 = vmatprep.subr.bf16.mxu0 %v728_v0 }
  0x30   :  { %686 = vmatpush3.bf16.msra.mxu0 %v685_v62 }
  0x31   :  { %687 = vmatprep.subr.bf16.mxu0 %v728_v0 }
  0x34   :  { %689 = vmatpush3.bf16.msra.mxu0 %v688_v2 }
  0x35   :  { %690 = vmatprep.subr.bf16.mxu0 %v728_v0 }
  0x38   :  { %692 = vmatpush3.bf16.msra.mxu0 %v691_v6 }
  0x39   :  { %693 = vmatprep.subr.bf16.mxu0 %v728_v0 }
  0x3c   :  { %695 = vmatpush3.bf16.msra.mxu0 %v694_v9 }
  0x3d   :  { %696 = vmatprep.subr.bf16.mxu0 %v728_v0 }
  0x40   :  { %698 = vmatpush3.bf16.msra.mxu0 %v697_v17 }
  0xf6   :  { %v122_v11 = vpop.f32.mrb[0].mxu0 }
  0xf7   :  { %v123_v12 = vadd.f32 %v415_v10, %v122_v11  ;;  %v521_v13 = vpop.f32.mrb[1].mxu0 }
  0xf9   :  { %v126_v14 = vmax.f32 %v123_v12, 0.0 }
  0xfb   :  { %555 = vmatmul.mubr.f32.vlgmr.msra.gmra.mrb[0].mxu1 %v126_v14 }
  0xfc   :  { %624 = vmatprep.mubr.msk.f32.mxu1 %vm729_vm0, %v730_v4  ;;  %v317_v4 = vld [vmem:[%s1036_s7 + $0x10] sm:$0xff]  ;;  %701 = vmatpush3.bf16.msra.mxu1 %v700_v20 }
  0xfd   :  { %v703_v22 = vpack.c.bf16 %v318_v21, %v317_v4  ;;  %702 = vmatprep.subr.bf16.mxu1 %v728_v0 }
 0x100   :  { %704 = vmatpush3.bf16.msra.mxu1 %v703_v22 }
 0x101   :  { %705 = vmatprep.subr.bf16.mxu1 %v728_v0 }
 0x104   :  { %707 = vmatpush3.bf16.msra.mxu1 %v706_v25 }
 0x105   :  { %708 = vmatprep.subr.bf16.mxu1 %v728_v0 }
 0x108   :  { %710 = vmatpush3.bf16.msra.mxu1 %v709_v28 }
 0x109   :  { %711 = vmatprep.subr.bf16.mxu1 %v728_v0 }
 0x10c   :  { %713 = vmatpush3.bf16.msra.mxu1 %v712_v31 }
 0x10d   :  { %714 = vmatprep.subr.bf16.mxu1 %v728_v0 }
 0x110   :  { %716 = vmatpush3.bf16.msra.mxu1 %v715_v34 }
 0x111   :  { %717 = vmatprep.subr.bf16.mxu1 %v728_v0 }
 0x114   :  { %719 = vmatpush3.bf16.msra.mxu1 %v718_v37 }
 0x115   :  { %720 = vmatprep.subr.bf16.mxu1 %v728_v0  ;;  %v417_v0 = vld [vmem:[%s1038_s6] ss:$0 sm:$0xff] }
 0x118   :  { %722 = vmatpush3.bf16.msra.mxu1 %v721_v45 }
 0x1ce   :  { %v216_v39 = vpop.f32.mrb[0].mxu1 }
 0x1cf   :  { %v217_v40 = vadd.f32 %v416_v38, %v216_v39  ;;  %v556_v41 = vpop.f32.mrb[1].mxu1 }
 0x1d1   :  { %v220_v42 = vmax.f32 %v217_v40, 0.0 }
 0x1d3   :  { %590 = vmatmul.mubr.f32.vlgmr.msra.gmra.mrb[2].mxu0 %v220_v42 }
 0x2a6   :  { %v310_v46 = vpop.f32.mrb[2].mxu0 }
 0x2a7   :  { %v311_v47 = vadd.f32 %v417_v0, %v310_v46  ;;  %v591_v48 = vpop.f32.mrb[3].mxu0 }
 0x2a9   :  { %v314_v49 = vmax.f32 %v311_v47, 0.0 }
 0x2ab   :  { %625 = vmatmul.mubr.f32.vlgmr.msra.gmra.mrb[2].mxu1 %v314_v49 }
 0x37e   :  { %v404_v51 = vpop.f32.mrb[2].mxu1 }
 0x37f   :  { %v405_v52 = vadd.f32 %v418_v50, %v404_v51  ;;  %v626_v53 = vpop.f32.mrb[3].mxu1 }
 0x381   :  { %726 = vtanh.f32 %v405_v52 }
 0x38b   :  { %v727_v54 = vpop.eup %726 }
 0x38c   :  { %v409_v55 = vmul.f32 0.05, %v727_v54 }
 0x38e   :  { %410 = vst [vmem:[%s1040_s9] sm:$0xff] %v409_v55 }

</bundles_post_ra>
